<compile_context>
chip_gen: v5e
topology: v5e:2x2
jax: 0.10.0
libtpu: 0.0.40
codegen_flags: <defaults>
</compile_context>

<pallas_src>
import math

import jax
import jax.numpy as jnp
from jax.experimental import pallas as pl
from jax.experimental.pallas import tpu as pltpu

NUM_CLASSES = 10
RECON_WEIGHT = 0.0005

_MIB = 1024 * 1024


def _get_int_attr(obj, names):
    for name in names:
        v = getattr(obj, name, None)
        if v is None:
            continue
        try:
            return int(v)
        except (TypeError, ValueError):
            continue
    return None


def _tpu_params():
    """Best-effort (vmem_capacity_bytes, tensorcores_per_chip).

    Falls back to conservative values (64 MiB, 1 core) if the query fails,
    which keeps the kernel correct (just not maximally tuned) everywhere.
    """
    cap = None
    cores = 1
    try:
        info = pltpu.get_tpu_info()
        cap = _get_int_attr(
            info, ("vmem_capacity_bytes", "vmem_size_bytes", "vmem_bytes")
        )
        c = _get_int_attr(
            info,
            ("num_tensorcores", "tensorcores_per_chip", "cores_per_chip", "num_cores"),
        )
        if c is not None and 1 <= c <= 8:
            cores = c
        else:
            ver = str(getattr(info, "chip_version", ""))
            # 64-MiB-per-TensorCore parts (v7x) carry 2 TensorCores per chip.
            if "7" in ver or (cap is not None and cap <= 80 * _MIB):
                cores = 2
    except Exception:
        pass
    if cap is None or cap <= 0:
        cap = 64 * _MIB  # conservative: fits v7x per-TC VMEM
    return int(cap), int(cores)


def _budgets(vmem_cap):
    # Streaming budget for the big double-buffered inputs + f32 temporaries,
    # and the scoped VMEM limit handed to Mosaic.  128 MiB parts -> 48/96 MiB;
    # 64 MiB parts -> 24/48 MiB.
    stream = min(max(vmem_cap * 3 // 8, 8 * _MIB), 48 * _MIB)
    limit = min(max(vmem_cap * 3 // 4, 32 * _MIB), 100 * _MIB)
    return stream, limit


def _pick_block_rows(batch, bytes_per_row, stream_budget, max_rows=None):
    """Batch tile TB sized by bytes (no artificial row cap)."""
    tb = stream_budget // max(1, bytes_per_row)
    tb = max(8, (tb // 8) * 8)  # sublane multiple
    if max_rows is not None:
        tb = min(tb, max(8, ((max_rows + 7) // 8) * 8))
    if tb >= batch:
        # Single block covering the whole (possibly non-multiple-of-8) batch:
        # block == full array dim, so no (8,128) issue and no masking needed.
        return batch
    return tb


def _fold_rows(acc_ref, tile):
    """acc_ref[(8, C)] += row-folded `tile[(rows, C)]` using only VPU adds."""
    rows, cols = tile.shape
    ngroups, rem = divmod(rows, 8)
    if ngroups:
        acc_ref[...] += tile[: ngroups * 8, :].reshape(ngroups, 8, cols).sum(axis=0)
    if rem:
        acc_ref[0:rem, :] += tile[ngroups * 8 :, :]


def _make_capsule_loss_kernel(b_total, tb, needs_mask):
    def kernel(x_ref, lab_ref, img_ref, rec_ref, out_ref, acc_ref, macc_ref):
        # x_ref:   (TB, NC)  logits (native dtype)
        # lab_ref: (TB, 1)   int32 class indices
        # img_ref: (TB, D)   flattened images (native dtype)
        # rec_ref: (TB, D)   flattened reconstructions (native dtype)
        # out_ref: (1, 1)    f32 per-core partial loss (SMEM)
        # acc_ref: (8, D)    f32 recon sum-of-squares accumulator (VMEM)
        # macc_ref:(8, NC)   f32 margin accumulator (VMEM)
        c = pl.program_id(0)   # core / parallel axis
        j = pl.program_id(1)   # reduction axis (per-core serial loop)
        nj = pl.num_programs(1)

        @pl.when(j == 0)
        def _init():
            acc_ref[...] = jnp.zeros_like(acc_ref)
            macc_ref[...] = jnp.zeros_like(macc_ref)

        rows, nc = x_ref.shape

        if needs_mask:
            # Validity mask from the UNCLAMPED global block index: rows of the
            # partial last block and of clamped duplicate blocks are zeroed.
            row0 = (c * nj + j) * tb
            row_ids = row0 + jax.lax.broadcasted_iota(jnp.int32, (rows, 1), 0)
            row_valid = row_ids < b_total
        else:
            row_valid = None

        # ---- margin term for this batch tile (tiny: TB x NUM_CLASSES) ----
        x = x_ref[...].astype(jnp.float32)
        col = jax.lax.broadcasted_iota(jnp.int32, (rows, nc), 1)
        onehot = (col == lab_ref[...]).astype(jnp.float32)
        left = jnp.maximum(0.9 - x, 0.0)
        left = left * left
        right = jnp.maximum(x - 0.1, 0.0)
        right = right * right
        half_right = 0.5 * right
        margin_tile = half_right + onehot * (left - half_right)
        if row_valid is not None:
            margin_tile = jnp.where(row_valid, margin_tile, 0.0)
        _fold_rows(macc_ref, margin_tile)

        # ---- reconstruction sum-of-squares for this tile (VPU-only fold) ----
        diff = rec_ref[...].astype(jnp.float32) - img_ref[...].astype(jnp.float32)
        sq = diff * diff
        if row_valid is not None:
            sq = jnp.where(row_valid, sq, 0.0)
        _fold_rows(acc_ref, sq)

        # ---- finalize: single cross-lane reduce + combine (per core) ----
        @pl.when(j == nj - 1)
        def _finalize():
            margin_sum = jnp.sum(macc_ref[...])
            recon_sum = jnp.sum(acc_ref[...])
            out_ref[0, 0] = (
                margin_sum / jnp.float32(b_total)
                + jnp.float32(RECON_WEIGHT) * recon_sum
            )

    return kernel


def capsule_loss(images, output, labels, m, recon, max_block_rows=None):
    """images/recon: (B, C, H, W); output: (B, NUM_CLASSES); labels: (B,) int.

    `m` (spread-loss margin) is accepted for API parity but unused by
    margin_loss, matching the PyTorch reference.
    """
    del m  # unused by the margin_loss branch
    b = images.shape[0]
    d = int(math.prod(images.shape[1:]))
    nc = output.shape[-1]

    # Keep native dtypes (no wrapper astype) — the kernel upcasts in-register.
    img_flat = images.reshape(b, d)
    rec_flat = recon.reshape(b, d)
    x = output
    lab = labels.astype(jnp.int32).reshape(b, 1)

    vmem_cap, hw_cores = _tpu_params()
    stream_budget, vmem_limit = _budgets(vmem_cap)

    # Per-row VMEM cost: streamed tiles are double-buffered (x2) in native
    # dtype (x/lab lane-padded to 128); f32 temporaries are single-buffered.
    per_row_stream = (
        d * (img_flat.dtype.itemsize + rec_flat.dtype.itemsize)
        + 128 * (x.dtype.itemsize + lab.dtype.itemsize)
    )
    per_row_temp = 2 * 4 * d
    tb = _pick_block_rows(
        b, 2 * per_row_stream + per_row_temp, stream_budget, max_block_rows
    )

    nb = pl.cdiv(b, tb)                       # number of real batch blocks
    num_cores = min(hw_cores, nb) if (hw_cores > 1 and nb >= 2) else 1
    spc = pl.cdiv(nb, num_cores)              # grid steps per core
    total_blocks = num_cores * spc
    needs_mask = (b != nb * tb) or (total_blocks != nb)

    if total_blocks == nb:
        def row_map(c, j):
            return (c * spc + j, 0)
    else:
        # Clamp so no block is ever fully out of bounds; duplicated blocks are
        # zeroed by the in-kernel mask (which uses the unclamped index).
        def row_map(c, j):
            return (jnp.minimum(c * spc + j, nb - 1), 0)

    kernel = _make_capsule_loss_kernel(b, tb, needs_mask)

    cost = pl.CostEstimate(
        flops=3 * b * d + 10 * b * nc,
        transcendentals=0,
        bytes_accessed=(
            b * d * (img_flat.dtype.itemsize + rec_flat.dtype.itemsize)
            + b * nc * x.dtype.itemsize
            + b * lab.dtype.itemsize
            + 4 * num_cores
        ),
    )

    partials = pl.pallas_call(
        kernel,
        out_shape=jax.ShapeDtypeStruct((num_cores, 1), jnp.float32),
        grid=(num_cores, spc),
        in_specs=[
            pl.BlockSpec((tb, nc), row_map),
            pl.BlockSpec((tb, 1), row_map),
            pl.BlockSpec((tb, d), row_map),
            pl.BlockSpec((tb, d), row_map),
        ],
        out_specs=pl.BlockSpec(
            (1, 1), lambda c, j: (c, 0), memory_space=pltpu.MemorySpace.SMEM
        ),
        scratch_shapes=[
            pltpu.VMEM((8, d), jnp.float32),
            pltpu.VMEM((8, nc), jnp.float32),
        ],
        compiler_params=pltpu.CompilerParams(
            dimension_semantics=("parallel", "arbitrary"),
            vmem_limit_bytes=int(vmem_limit),
        ),
        cost_estimate=cost,
    )(x, lab, img_flat, rec_flat)
    return jnp.sum(partials)


def _reference_loss(images, output, labels, m, recon):
    del m
    b = images.shape[0]
    onehot = jax.nn.one_hot(labels, NUM_CLASSES, dtype=jnp.float32)
    x = output.astype(jnp.float32)
    left = jnp.maximum(0.9 - x, 0.0) ** 2
    right = jnp.maximum(x - 0.1, 0.0) ** 2
    margin = jnp.sum(onehot * left + 0.5 * (1.0 - onehot) * right) / b
    diff = recon.astype(jnp.float32) - images.astype(jnp.float32)
    return margin + RECON_WEIGHT * jnp.sum(diff * diff)


if __name__ == "__main__":
    key = jax.random.PRNGKey(0)
    k1, k2, k3, k4 = jax.random.split(key, 4)

    # Case 1: small batch (single-tile path, no masking).
    B, C, H, W = 2, 4, 16, 16
    images = jax.random.uniform(k1, (B, C, H, W), dtype=jnp.float32)
    recon = jax.random.uniform(k2, (B, C, H, W), dtype=jnp.float32)
    output = jax.random.uniform(k3, (B, NUM_CLASSES), dtype=jnp.float32)
    labels = jax.random.randint(k4, (B,), 0, NUM_CLASSES, dtype=jnp.int32)
    m = jnp.float32(0.2)  # unused by margin_loss (parity with PyTorch signature)

    loss = jax.block_until_ready(capsule_loss(images, output, labels, m, recon))
    ref = _reference_loss(images, output, labels, m, recon)
    assert jnp.allclose(loss, ref, rtol=1e-4, atol=1e-3), (loss, ref)

    # Case 2: ragged batch with a forced small tile to exercise the gridded
    # accumulator path and in-kernel row masking (10 rows -> 2 tiles of 8).
    kk = jax.random.split(jax.random.PRNGKey(1), 4)
    B2 = 10
    images2 = jax.random.uniform(kk[0], (B2, C, H, W), dtype=jnp.float32)
    recon2 = jax.random.uniform(kk[1], (B2, C, H, W), dtype=jnp.float32)
    output2 = jax.random.uniform(kk[2], (B2, NUM_CLASSES), dtype=jnp.float32)
    labels2 = jax.random.randint(kk[3], (B2,), 0, NUM_CLASSES, dtype=jnp.int32)

    loss2 = jax.block_until_ready(
        capsule_loss(images2, output2, labels2, m, recon2, max_block_rows=8)
    )
    ref2 = _reference_loss(images2, output2, labels2, m, recon2)
    assert jnp.allclose(loss2, ref2, rtol=1e-4, atol=1e-3), (loss2, ref2)

    # Case 3: bf16 image/recon streams, odd block count (17 rows -> 3 tiles of
    # 8) — exercises native-dtype upcast, masking, and (on 2-TC parts) the
    # clamped duplicate-block path of the core split.
    kj = jax.random.split(jax.random.PRNGKey(2), 4)
    B3 = 17
    images3 = jax.random.uniform(kj[0], (B3, C, H, W), dtype=jnp.bfloat16)
    recon3 = jax.random.uniform(kj[1], (B3, C, H, W), dtype=jnp.bfloat16)
    output3 = jax.random.uniform(kj[2], (B3, NUM_CLASSES), dtype=jnp.float32)
    labels3 = jax.random.randint(kj[3], (B3,), 0, NUM_CLASSES, dtype=jnp.int32)

    loss3 = jax.block_until_ready(
        capsule_loss(images3, output3, labels3, m, recon3, max_block_rows=8)
    )
    ref3 = _reference_loss(images3, output3, labels3, m, recon3)
    assert jnp.allclose(loss3, ref3, rtol=1e-4, atol=1e-3), (loss3, ref3)

    print("KERNEL_OK")
</pallas_src>

<mosaic_0001>
module attributes {stable_mosaic.version = 11 : i64} {
  func.func @kernel(%arg0: i32, %arg1: i32, %arg2: memref<2x10xf32, #tpu.memory_space<vmem>>, %arg3: memref<2x1xi32, #tpu.memory_space<vmem>>, %arg4: memref<2x1024xf32, #tpu.memory_space<vmem>>, %arg5: memref<2x1024xf32, #tpu.memory_space<vmem>>, %arg6: memref<1x1xf32, #tpu.memory_space<smem>>, %arg7: memref<8x1024xf32, #tpu.memory_space<vmem>>, %arg8: memref<8x10xf32, #tpu.memory_space<vmem>>) attributes {dimension_semantics = [#tpu.dimension_semantics<parallel>, #tpu.dimension_semantics<arbitrary>], iteration_bounds = array<i64: 1, 1>, scalar_prefetch = 0 : i64, scratch_operands = 2 : i64, tpu.core_type = #tpu.core_type<tc>, window_params = [{transform_indices = @transform_0, window_bounds = array<i64: 2, 10>}, {transform_indices = @transform_1, window_bounds = array<i64: 2, 1>}, {transform_indices = @transform_2, window_bounds = array<i64: 2, 1024>}, {transform_indices = @transform_3, window_bounds = array<i64: 2, 1024>}, {transform_indices = @transform_4, window_bounds = array<i64: 1, 1>}]} {
    %c0_i32 = arith.constant 0 : i32
    %0 = arith.cmpi eq, %arg1, %c0_i32 : i32
    %1 = arith.extui %0 : i1 to i32
    %c0_i32_0 = arith.constant 0 : i32
    %2 = arith.cmpi ne, %1, %c0_i32_0 : i32
    scf.if %2 {
      %cst_22 = arith.constant 0.000000e+00 : f32
      %38 = vector.broadcast %cst_22 : f32 to vector<8x1024xf32>
      %c0_23 = arith.constant 0 : index
      %c0_24 = arith.constant 0 : index
      %39 = vector.load %arg7[%c0_23, %c0_24] : memref<8x1024xf32, #tpu.memory_space<vmem>>, vector<8x1024xf32>
      tpu.vector_store %arg7[%c0_23, %c0_24], %38 {strides = array<i32>} : memref<8x1024xf32, #tpu.memory_space<vmem>>, vector<8x1024xf32>,
      %cst_25 = arith.constant 0.000000e+00 : f32
      %40 = vector.broadcast %cst_25 : f32 to vector<8x10xf32>
      %c0_26 = arith.constant 0 : index
      %c0_27 = arith.constant 0 : index
      %41 = vector.load %arg8[%c0_26, %c0_27] : memref<8x10xf32, #tpu.memory_space<vmem>>, vector<8x10xf32>
      tpu.vector_store %arg8[%c0_26, %c0_27], %40 {strides = array<i32>} : memref<8x10xf32, #tpu.memory_space<vmem>>, vector<8x10xf32>,
    } else {
    }
    %c0 = arith.constant 0 : index
    %c0_1 = arith.constant 0 : index
    %3 = vector.load %arg2[%c0, %c0_1] : memref<2x10xf32, #tpu.memory_space<vmem>>, vector<2x10xf32>
    %4 = tpu.iota {dimensions = array<i32: 1>} : vector<2x10xi32>
    %c0_2 = arith.constant 0 : index
    %c0_3 = arith.constant 0 : index
    %5 = vector.load %arg3[%c0_2, %c0_3] : memref<2x1xi32, #tpu.memory_space<vmem>>, vector<2x1xi32>
    %6 = vector.broadcast %5 : vector<2x1xi32> to vector<2x10xi32>
    %7 = arith.cmpi eq, %4, %6 : vector<2x10xi32>
    %8 = arith.extui %7 : vector<2x10xi1> to vector<2x10xi32>
    %9 = arith.sitofp %8 : vector<2x10xi32> to vector<2x10xf32>
    %cst = arith.constant 0.899999976 : f32
    %10 = vector.broadcast %cst : f32 to vector<2x10xf32>
    %11 = arith.subf %10, %3 : vector<2x10xf32>
    %cst_4 = arith.constant 0.000000e+00 : f32
    %12 = vector.broadcast %cst_4 : f32 to vector<2x10xf32>
    %13 = arith.maximumf %11, %12 : vector<2x10xf32>
    %14 = arith.mulf %13, %13 : vector<2x10xf32>
    %cst_5 = arith.constant 1.000000e-01 : f32
    %15 = vector.broadcast %cst_5 : f32 to vector<2x10xf32>
    %16 = arith.subf %3, %15 : vector<2x10xf32>
    %cst_6 = arith.constant 0.000000e+00 : f32
    %17 = vector.broadcast %cst_6 : f32 to vector<2x10xf32>
    %18 = arith.maximumf %16, %17 : vector<2x10xf32>
    %19 = arith.mulf %18, %18 : vector<2x10xf32>
    %cst_7 = arith.constant 5.000000e-01 : f32
    %20 = vector.broadcast %cst_7 : f32 to vector<2x10xf32>
    %21 = arith.mulf %20, %19 : vector<2x10xf32>
    %22 = arith.subf %14, %21 : vector<2x10xf32>
    %23 = arith.mulf %9, %22 : vector<2x10xf32>
    %24 = arith.addf %21, %23 : vector<2x10xf32>
    %c0_8 = arith.constant 0 : index
    %c0_9 = arith.constant 0 : index
    %25 = vector.load %arg8[%c0_8, %c0_9] : memref<8x10xf32, #tpu.memory_space<vmem>>, vector<2x10xf32>
    %26 = arith.addf %25, %24 : vector<2x10xf32>
    %c0_10 = arith.constant 0 : index
    %c0_11 = arith.constant 0 : index
    %27 = vector.load %arg8[%c0_10, %c0_11] : memref<8x10xf32, #tpu.memory_space<vmem>>, vector<2x10xf32>
    tpu.vector_store %arg8[%c0_10, %c0_11], %26 {strides = array<i32>} : memref<8x10xf32, #tpu.memory_space<vmem>>, vector<2x10xf32>,
    %c0_12 = arith.constant 0 : index
    %c0_13 = arith.constant 0 : index
    %28 = vector.load %arg5[%c0_12, %c0_13] : memref<2x1024xf32, #tpu.memory_space<vmem>>, vector<2x1024xf32>
    %c0_14 = arith.constant 0 : index
    %c0_15 = arith.constant 0 : index
    %29 = vector.load %arg4[%c0_14, %c0_15] : memref<2x1024xf32, #tpu.memory_space<vmem>>, vector<2x1024xf32>
    %30 = arith.subf %28, %29 : vector<2x1024xf32>
    %31 = arith.mulf %30, %30 : vector<2x1024xf32>
    %c0_16 = arith.constant 0 : index
    %c0_17 = arith.constant 0 : index
    %32 = vector.load %arg7[%c0_16, %c0_17] : memref<8x1024xf32, #tpu.memory_space<vmem>>, vector<2x1024xf32>
    %33 = arith.addf %32, %31 : vector<2x1024xf32>
    %c0_18 = arith.constant 0 : index
    %c0_19 = arith.constant 0 : index
    %34 = vector.load %arg7[%c0_18, %c0_19] : memref<8x1024xf32, #tpu.memory_space<vmem>>, vector<2x1024xf32>
    tpu.vector_store %arg7[%c0_18, %c0_19], %33 {strides = array<i32>} : memref<8x1024xf32, #tpu.memory_space<vmem>>, vector<2x1024xf32>,
    %c0_i32_20 = arith.constant 0 : i32
    %35 = arith.cmpi eq, %arg1, %c0_i32_20 : i32
    %36 = arith.extui %35 : i1 to i32
    %c0_i32_21 = arith.constant 0 : i32
    %37 = arith.cmpi ne, %36, %c0_i32_21 : i32
    scf.if %37 {
      %c0_22 = arith.constant 0 : index
      %c0_23 = arith.constant 0 : index
      %38 = vector.load %arg8[%c0_22, %c0_23] : memref<8x10xf32, #tpu.memory_space<vmem>>, vector<8x10xf32>
      %39 = vector.shape_cast %38 : vector<8x10xf32> to vector<1x8x10xf32>
      %cst_24 = arith.constant dense<0.000000e+00> : vector<1xf32>
      %40 = vector.multi_reduction <add>, %39, %cst_24 [1, 2] : vector<1x8x10xf32> to vector<1xf32>
      %41 = vector.shape_cast %40 : vector<1xf32> to vector<1x1x1xf32>
      %42 = vector.extract %41[0, 0, 0] : f32 from vector<1x1x1xf32>
      %c0_25 = arith.constant 0 : index
      %c0_26 = arith.constant 0 : index
      %43 = vector.load %arg7[%c0_25, %c0_26] : memref<8x1024xf32, #tpu.memory_space<vmem>>, vector<8x1024xf32>
      %44 = vector.shape_cast %43 : vector<8x1024xf32> to vector<1x8x1024xf32>
      %cst_27 = arith.constant dense<0.000000e+00> : vector<1xf32>
      %45 = vector.multi_reduction <add>, %44, %cst_27 [1, 2] : vector<1x8x1024xf32> to vector<1xf32>
      %46 = vector.shape_cast %45 : vector<1xf32> to vector<1x1x1xf32>
      %47 = vector.extract %46[0, 0, 0] : f32 from vector<1x1x1xf32>
      %cst_28 = arith.constant 2.000000e+00 : f32
      %48 = arith.divf %42, %cst_28 : f32
      %cst_29 = arith.constant 5.000000e-04 : f32
      %49 = arith.mulf %cst_29, %47 : f32
      %50 = arith.addf %48, %49 : f32
      %c0_30 = arith.constant 0 : index
      %c0_31 = arith.constant 0 : index
      %51 = memref.load %arg6[%c0_30, %c0_31] : memref<1x1xf32, #tpu.memory_space<smem>>
      memref.store %50, %arg6[%c0_30, %c0_31] : memref<1x1xf32, #tpu.memory_space<smem>>
    } else {
    }
    return
  }
  func.func @transform_0(%arg0: i32, %arg1: i32) -> (i32, i32) {
    %c1_i32 = arith.constant 1 : i32
    %0 = arith.muli %arg0, %c1_i32 : i32
    %1 = arith.addi %0, %arg1 : i32
    %c0_i32 = arith.constant 0 : i32
    %c0_i32_0 = arith.constant 0 : i32
    return %1, %c0_i32 : i32, i32
  }
  func.func @transform_1(%arg0: i32, %arg1: i32) -> (i32, i32) {
    %c1_i32 = arith.constant 1 : i32
    %0 = arith.muli %arg0, %c1_i32 : i32
    %1 = arith.addi %0, %arg1 : i32
    %c0_i32 = arith.constant 0 : i32
    %c0_i32_0 = arith.constant 0 : i32
    return %1, %c0_i32 : i32, i32
  }
  func.func @transform_2(%arg0: i32, %arg1: i32) -> (i32, i32) {
    %c1_i32 = arith.constant 1 : i32
    %0 = arith.muli %arg0, %c1_i32 : i32
    %1 = arith.addi %0, %arg1 : i32
    %c0_i32 = arith.constant 0 : i32
    %c0_i32_0 = arith.constant 0 : i32
    return %1, %c0_i32 : i32, i32
  }
  func.func @transform_3(%arg0: i32, %arg1: i32) -> (i32, i32) {
    %c1_i32 = arith.constant 1 : i32
    %0 = arith.muli %arg0, %c1_i32 : i32
    %1 = arith.addi %0, %arg1 : i32
    %c0_i32 = arith.constant 0 : i32
    %c0_i32_0 = arith.constant 0 : i32
    return %1, %c0_i32 : i32, i32
  }
  func.func @transform_4(%arg0: i32, %arg1: i32) -> (i32, i32) {
    %c0_i32 = arith.constant 0 : i32
    %c0_i32_0 = arith.constant 0 : i32
    return %arg0, %c0_i32 : i32, i32
  }
}

</mosaic_0001>

<bundles_post_ra>
// kernel: tpu_custom_call.1
= control target key start
LH: loop header
LB: loop body
LE: loop exit
PB: predicated region body
PF: predicated region fallthrough
CT: control target
= control target key end

     0   :  { %9 = vsyncpa [#allocation5], 0  ;;  %s403_s0 = inlined_call_operand.vmem [shape: f32[2,10], index: 0, kind: input, shape index: {}]   ;;  %s404_s1 = inlined_call_operand.vmem [shape: s32[2,1], index: 1, kind: input, shape index: {}]   ;;  %s405_s2 = inlined_call_operand.hbm [shape: f32[2,1024], index: 2, kind: input, shape index: {}]   ;;  %s406_s3 = inlined_call_operand.hbm [shape: f32[2,1024], index: 3, kind: input, shape index: {}]   ;;  %s407_s4 = inlined_call_operand.hbm [shape: f32[1,1], index: 4, kind: output, shape index: {}]  }
   0x1   :  { %10 = vsyncpa [#allocation8], 0 }
   0x2   :  { %11 = vsyncpa [#allocation6], 0  ;;  %s37_s17 = sshll.u32 %s405_s2, 4  ;;  %s345_s18 = smov [#allocation4]   ;;  %s38_s17 = int_to_ptr.hbm [resolvable:$true] %s37_s17 }
   0x3   :  { %s39_s19 = sshll.u32 %s345_s18, 4  ;;  %s52_s22 = sshll.u32 %s406_s3, 4  ;;  %s40_s19 = int_to_ptr.vmem [resolvable:$true] %s39_s19  ;;  %s53_s22 = int_to_ptr.hbm [resolvable:$true] %s52_s22 }
   0x4   :  { %42 = dma.hbm_to_vmem [thread:$0]  %s38_s17, 256, %s40_s19, [#allocation5]  }
   0x5   :  { %s346_s23 = smov [#allocation7]  }
   0x6   :  { %s54_s24 = sshll.u32 %s346_s23, 4  ;;  %s55_s24 = int_to_ptr.vmem [resolvable:$true] %s54_s24 }
   0x7   :  { %57 = dma.hbm_to_vmem [thread:$0]  %s53_s22, 256, %s55_s24, [#allocation8]  }
   0x8   :  { %339 = dma.done.wait [#allocation5], 256  }
   0x9   :  { %340 = vsyncadd [#allocation5], 4294967040 }
   0xa   :  { %341 = dma.done.wait [#allocation8], 256  }
   0xb   :  { %342 = vsyncadd [#allocation8], 4294967040  ;;  %v347_v0 = vmov 0   ;;  %v348_v1 = vmov 0.0   ;;  %v107_v2 = vld [vmem:[%s404_s1] sm:$0x3]  ;;  %v105_v56 = vlaneseq }
   0xc   :  { %276 = vset.pattern.permute.xlu0 %v347_v0  ;;  %94 = vst [vmem:[#allocation2 + $0x30] sm:$0xff] %v348_v1  ;;  %v128_v3 = vld [vmem:[#allocation7] sm:$0xff]  ;;  %v130_v4 = vld [vmem:[#allocation4] sm:$0xff]  ;;  %v129_v7 = vld [vmem:[#allocation7 + $0x8] sm:$0xff]  ;;  %vm102_vm0 = vcmask 80896   ;;  %vm126_vm2 = vcmask 74752  }
   0xd   :  { %95 = vst [vmem:[#allocation2] sm:$0xff] %v348_v1  ;;  %109 = vperm.xlu0 %276, %v107_v2   ;;  %v132_v5 = vsub.f32 %v128_v3, %v130_v4  ;;  %v131_v8 = vld [vmem:[#allocation4 + $0x8] sm:$0xff]  ;;  %v104_v49 = vld [vmem:[%s403_s0] sm:$0x3]  ;;  %v106_v59 = vand.u32 127, %v105_v56  ;;  %s238_s29 = sshll.u32 %s407_s4, 4  ;;  %s239_s29 = int_to_ptr.hbm [resolvable:$true] %s238_s29 }
   0xe   :  { %96 = vst [vmem:[#allocation2 + $0x18] sm:$0xff] %v348_v1  ;;  %v133_v9 = vsub.f32 %v129_v7, %v131_v8  ;;  %v263_v51 = vadd.f32 -0.1, %v104_v49  ;;  %v114_v52 = vsub.f32 0.9, %v104_v49  ;;  %s350_s8 = smov [#allocation9]  }
   0xf   :  { %97 = vst [vmem:[#allocation2 + $0x10] sm:$0xff] %v348_v1  ;;  %v134_v6 = vmul.f32 %v132_v5, %v132_v5 }
  0x10   :  { %98 = vst [vmem:[#allocation2 + $0x8] sm:$0xff] %v348_v1  ;;  %v135_v10 = vmul.f32 %v133_v9, %v133_v9  ;;  %v118_v53 = vmax.f32 %v263_v51, 0.0  ;;  %v115_v54 = vmax.f32 %v114_v52, 0.0 }
  0x11   :  { %99 = vst [vmem:[#allocation2 + $0x20] sm:$0xff] %v348_v1 }
  0x12   :  { %100 = vst [vmem:[#allocation2 + $0x28] sm:$0xff] %v348_v1  ;;  %v119_v55 = vmul.f32 %v118_v53, %v118_v53  ;;  %v116_v57 = vmul.f32 %v115_v54, %v115_v54 }
  0x13   :  { %101 = vst [vmem:[#allocation2 + $0x38] sm:$0xff] %v348_v1  ;;  %v136_v11 = vld [vmem:[#allocation2 + $0x30] sm:$0x3] }
  0x14   :  { %146 = vst [vmem:[#allocation1] ss:$4 sm:$0xff] %v134_v6  ;;  %v137_v12 = vld [vmem:[#allocation2] sm:$0x3]  ;;  %v120_v58 = vmul.f32 0.5, %v119_v55  ;;  %v349_v6 = vmov 2.0  }
  0x15   :  { %148 = vst [vmem:[#allocation1 + $0x20] ss:$4 sm:$0xff] %v135_v10  ;;  %v138_v15 = vld [vmem:[#allocation2 + $0x18] sm:$0x3]  ;;  %277 = vrcp.f32 %v349_v6 }
  0x16   :  { %v139_v20 = vld [vmem:[#allocation2 + $0x10] sm:$0x3]  ;;  %103 = vst.msk [vmem:[#allocation3] sm:$0xff] %vm102_vm0, %v348_v1  ;;  %v121_v60 = vsub.f32 %v116_v57, %v120_v58 }
  0x17   :  { %v140_v23 = vld [vmem:[#allocation2 + $0x8] sm:$0x3] }
  0x18   :  { %v141_v25 = vld [vmem:[#allocation2 + $0x20] sm:$0x3] }
  0x19   :  { %v142_v28 = vld [vmem:[#allocation2 + $0x28] sm:$0x3] }
  0x1a   :  { %v143_v32 = vld [vmem:[#allocation2 + $0x38] sm:$0x3] }
  0x1b   :  { %v149_v13 = vld.sshfl [vmem:[#allocation1] sm:$0xff pattern:$0x73625140]  ;;  %v150_v14 = vld.sshfl [vmem:[#allocation1 + $0x8] sm:$0xff pattern:$0x73625140]  ;;  %v278_v9 = vpop.eup %277 }
  0x1c   :  { %v151_v16 = vld.sshfl [vmem:[#allocation1 + $0x10] sm:$0xff pattern:$0x73625140]  ;;  %v165_v17 = vadd.f32 %v149_v13, %v136_v11  ;;  %v166_v18 = vadd.f32 %v150_v14, %v137_v12  ;;  %v152_v21 = vld.sshfl [vmem:[#allocation1 + $0x18] sm:$0xff pattern:$0x73625140]  ;;  %vm225_vm3 = vweird.f32 %v278_v9 }
  0x1d   :  { %v167_v19 = vadd.f32 %v151_v16, %v138_v15  ;;  %v168_v22 = vadd.f32 %v152_v21, %v139_v20  ;;  %v153_v24 = vld.sshfl [vmem:[#allocation1 + $0x20] sm:$0xff pattern:$0x73625140]  ;;  %v154_v27 = vld.sshfl [vmem:[#allocation1 + $0x28] sm:$0xff pattern:$0x73625140] }
  0x1e   :  { %173 = vst [vmem:[#allocation2 + $0x30] sm:$0x3] %v165_v17  ;;  %v169_v26 = vadd.f32 %v153_v24, %v140_v23  ;;  %v155_v29 = vld.sshfl [vmem:[#allocation1 + $0x30] sm:$0xff pattern:$0x73625140]  ;;  %v170_v30 = vadd.f32 %v154_v27, %v141_v25  ;;  %v221_v11 = vmul.f32 2.0, %v278_v9 }
  0x1f   :  { %174 = vst [vmem:[#allocation2] sm:$0x3] %v166_v18  ;;  %v171_v31 = vadd.f32 %v155_v29, %v142_v28  ;;  %v156_v33 = vld.sshfl [vmem:[#allocation1 + $0x38] sm:$0xff pattern:$0x73625140] }
  0x20   :  { %175 = vst [vmem:[#allocation2 + $0x18] sm:$0x3] %v167_v19  ;;  %v172_v34 = vadd.f32 %v156_v33, %v143_v32  ;;  %v124_v0 = vld [vmem:[#allocation3] sm:$0x3] }
  0x21   :  { %176 = vst [vmem:[#allocation2 + $0x10] sm:$0x3] %v168_v22 }
  0x22   :  { %177 = vst [vmem:[#allocation2 + $0x8] sm:$0x3] %v169_v26 }
  0x23   :  { %178 = vst [vmem:[#allocation2 + $0x20] sm:$0x3] %v170_v30 }
  0x24   :  { %179 = vst [vmem:[#allocation2 + $0x28] sm:$0x3] %v171_v31 }
  0x25   :  { %v196_v35 = vld [vmem:[#allocation2 + $0x30] sm:$0xff]  ;;  %180 = vst [vmem:[#allocation2 + $0x38] sm:$0x3] %v172_v34 }
  0x26   :  { %v197_v36 = vld [vmem:[#allocation2] sm:$0xff] }
  0x27   :  { %v198_v37 = vld [vmem:[#allocation2 + $0x18] sm:$0xff]  ;;  %v204_v38 = vadd.f32 %v197_v36, %v196_v35 }
  0x28   :  { %v199_v39 = vld [vmem:[#allocation2 + $0x10] sm:$0xff] }
  0x29   :  { %v205_v40 = vadd.f32 %v204_v38, %v198_v37  ;;  %v200_v41 = vld [vmem:[#allocation2 + $0x8] sm:$0xff] }
  0x2a   :  { %v201_v43 = vld [vmem:[#allocation2 + $0x20] sm:$0xff] }
  0x2b   :  { %v206_v42 = vadd.f32 %v205_v40, %v199_v39  ;;  %v202_v45 = vld [vmem:[#allocation2 + $0x28] sm:$0xff] }
  0x2c   :  { %v203_v47 = vld [vmem:[#allocation2 + $0x38] sm:$0xff] }
  0x2d   :  { %v207_v44 = vadd.f32 %v206_v42, %v200_v41 }
  0x2f   :  { %v208_v46 = vadd.f32 %v207_v44, %v201_v43 }
  0x31   :  { %v209_v48 = vadd.f32 %v208_v46, %v202_v45 }
  0x33   :  { %v210_v50 = vadd.f32 %v209_v48, %v203_v47 }
  0x35   :  { %211 = vadd.xlane.f32.xlu1 %v210_v50 }
  0x7f   :  { %v110_v61 = vpop.permute.xlu0 %109 }
  0x80   :  { %vm111_vm1 = vcmp.eq.s32.totalorder %v106_v59, %v110_v61 }
  0x81   :  { %v262_v62 = vsel %vm111_vm1, 1.0, %v348_v1  ;;  %v222_v1 = vsub.f32 1.0, %v221_v11 }
  0x82   :  { %v122_v63 = vmul.f32 %v262_v62, %v121_v60 }
  0x83   :  { %v223_v17 = vmul.f32 %v278_v9, %v222_v1 }
  0x84   :  { %v123_v2 = vadd.f32 %v122_v63, %v120_v58 }
  0x85   :  { %v224_v21 = vadd.f32 %v278_v9, %v223_v17 }
  0x86   :  { %v125_v3 = vadd.f32 %v124_v0, %v123_v2 }
  0x87   :  { %v226_v25 = vsel %vm225_vm3, %v278_v9, %v224_v21 }
  0x88   :  { %127 = vst.msk [vmem:[#allocation3] sm:$0x3] %vm126_vm2, %v125_v3 }
  0x8f   :  { %v184_v4 = vld [vmem:[#allocation3] sm:$0xff] }
  0x90   :  { %v186_v5 = vsel %vm102_vm0, %v184_v4, 0.0 }
  0x91   :  { %187 = vadd.xlane.f32.xlu0 %v186_v5 }
  0xa8   :  { %v212_v7 = vpop.xlane.xlu1 %211 }
  0xa9   :  { %v213_v8 = vrot.slane %v212_v7, 4 }
  0xab   :  { %v214_v10 = vadd.f32 %v213_v8, %v212_v7 }
  0xad   :  { %v215_v12 = vrot.slane %v214_v10, 2 }
  0xaf   :  { %v216_v16 = vadd.f32 %v215_v12, %v214_v10 }
  0xb1   :  { %v217_v20 = vrot.slane %v216_v16, 1 }
  0xb3   :  { %v218_v24 = vadd.f32 %v217_v20, %v216_v16 }
 0x104   :  { %v188_v13 = vpop.xlane.xlu0 %187 }
 0x105   :  { %v189_v14 = vrot.slane %v188_v13, 4 }
 0x107   :  { %v190_v15 = vadd.f32 %v189_v14, %v188_v13 }
 0x109   :  { %v191_v18 = vrot.slane %v190_v15, 2 }
 0x10b   :  { %v192_v19 = vadd.f32 %v191_v18, %v190_v15 }
 0x10d   :  { %v193_v22 = vrot.slane %v192_v19, 1 }
 0x10f   :  { %v194_v23 = vadd.f32 %v193_v22, %v192_v19 }
 0x111   :  { %264 = vpush %v194_v23 }
 0x112   :  { %266 = vpush %v218_v24 }
 0x113   :  { %268 = vpush %v226_v25 }
 0x142   :  { %s265_s0 = spop %264 }
 0x143   :  { %s267_s26 = spop %266 }
 0x144   :  { %s229_s30 = smul.f32 0.0005, %s267_s26  ;;  %s269_s5 = spop %268 }
 0x145   :  { %s228_s6 = smul.f32 %s269_s5, %s265_s0 }
 0x147   :  { %s230_s7 = sadd.f32 %s229_s30, %s228_s6 }
 0x149   :  { %232 = sst [smem:[#allocation9]] %s230_s7 }
 0x14a   :  { %241 = dma.smem_to_hbm %s350_s8, 16, %s239_s29, [#allocation6]  }
 0x14b   :  { %343 = dma.done.wait [#allocation6], 16  }
 0x14c   :  { %344 = vsyncadd [#allocation6], 4294967280 }
 0x14d   :  { %246 = sfence }
 0x14e   :  { %247 = vsyncpa [#allocation5], 1 }
 0x14f   :  { %248 = vsyncpa [#allocation8], 1 }
 0x150   :  { %249 = vsyncpa [#allocation6], 1 }

</bundles_post_ra>
